<compile_context>
chip_gen: v6e
topology: v6e:2x2x1
jax: 0.10.0
libtpu: 0.0.40
codegen_flags: <defaults>
</compile_context>

<pallas_src>
import jax
import jax.numpy as jnp
import numpy as np
from jax.experimental import pallas as pl
from jax.experimental.pallas import tpu as pltpu

_LANE = 128
_BLOCK_BYTES = 4 * 1024 * 1024        # per-block budget, safe on all chips
_VMEM_LIMIT_BYTES = 32 * 1024 * 1024  # explicit scoped-VMEM budget


def _copy_kernel(x_ref, o_ref):
    # The flatten itself is a free metadata reshape in the wrapper; the kernel
    # is a lane-dense identity copy running at the HBM/DMA roofline.
    o_ref[...] = x_ref[...]


def _round_up(x, m):
    return ((x + m - 1) // m) * m


def _num_tensorcores():
    """Best-effort TensorCore count of the local chip (2 on v7x, else 1)."""
    try:
        kind = (getattr(jax.devices()[0], "device_kind", "") or "").lower()
        if "v7" in kind:
            return 2
    except Exception:
        pass
    return 1


def _pick_tiles(n, d, itemsize):
    """Pick (bn, td) obeying the (8, 128) BlockSpec rule, never exceeding
    _BLOCK_BYTES, and preferring full-width rows (long contiguous DMAs)."""
    sub = max(8, 32 // itemsize)                 # dtype-aware sublane packing
    row_bytes = _round_up(d, _LANE) * itemsize   # VMEM cost of one padded row

    if sub * row_bytes <= _BLOCK_BYTES:
        # Full-row tiles: one long contiguous DMA per row, unmasked stores.
        td = d
        rows_fit = _BLOCK_BYTES // row_bytes
        if n <= rows_fit:
            bn = n                               # full extent: always legal
        else:
            bn = (rows_fit // sub) * sub         # >= sub, block <= budget
    else:
        # A single (sublane-padded) row exceeds the budget: split the feature
        # dim into lane-aligned chunks; edge block is masked by Pallas.
        bn = min(n, sub)
        td = max(_LANE, (_BLOCK_BYTES // (sub * itemsize)) // _LANE * _LANE)
        td = min(td, d)
    return bn, td


def flatten_pallas(x):
    """Pallas equivalent of torch `x.view(x.size(0), -1)` for any rank >= 1.

    NOTE: flatten is metadata-only; the production-fast path is simply
    `jnp.reshape(x, (x.shape[0], -1))` with no kernel.  The pallas_call keeps
    a real kernel in the path but aliases its output onto the input buffer
    (so the caller must not rely on reusing the flattened input afterwards).
    """
    n = x.shape[0]
    d = int(np.prod(x.shape[1:])) if x.ndim > 1 else 1
    dtype = x.dtype
    itemsize = jnp.dtype(dtype).itemsize

    # Row-major flatten of trailing dims == torch .view(n, -1): free.
    x2 = jnp.reshape(x, (n, d))

    bn, td = _pick_tiles(n, d, itemsize)

    # Only v7x has 2 TensorCores: force a grid of extent >= 2 there, splitting
    # the batch axis first so each DMA row stays full-width.
    if _num_tensorcores() >= 2 and pl.cdiv(n, bn) * pl.cdiv(d, td) == 1:
        sub = max(8, 32 // itemsize)
        if bn % (2 * sub) == 0:
            bn //= 2
        elif td % (2 * _LANE) == 0:
            td //= 2

    grid = (pl.cdiv(n, bn), pl.cdiv(d, td))

    out = pl.pallas_call(
        _copy_kernel,
        out_shape=jax.ShapeDtypeStruct((n, d), dtype),
        grid=grid,
        in_specs=[pl.BlockSpec((bn, td), lambda i, j: (i, j))],
        out_specs=pl.BlockSpec((bn, td), lambda i, j: (i, j)),
        input_output_aliases={0: 0},   # output aliases the (n, d) input view
        compiler_params=pltpu.CompilerParams(
            dimension_semantics=("parallel", "parallel"),
            vmem_limit_bytes=_VMEM_LIMIT_BYTES),
        cost_estimate=pl.CostEstimate(
            flops=0, transcendentals=0,
            bytes_accessed=2 * n * d * itemsize),
    )(x2)
    return out


if __name__ == "__main__":
    key = jax.random.PRNGKey(0)
    n, c, h, w = 2, 4, 16, 16
    x = jax.random.normal(key, (n, c, h, w), dtype=jnp.float32)

    # Reference (== torch x.view(x.size(0), -1)), materialized up-front since
    # the kernel output aliases the flattened input buffer.
    ref = np.asarray(jax.device_get(x)).reshape(n, -1)

    out = flatten_pallas(x)
    out = jax.block_until_ready(out)

    assert out.shape == (n, c * h * w), out.shape
    assert np.array_equal(np.asarray(jax.device_get(out)), ref), \
        "mismatch vs reference flatten"

    print("KERNEL_OK")
</pallas_src>

<mosaic_0001>
module attributes {stable_mosaic.version = 11 : i64} {
  func.func @_copy_kernel(%arg0: i32, %arg1: i32, %arg2: memref<2x1024xf32, #tpu.memory_space<vmem>>, %arg3: memref<2x1024xf32, #tpu.memory_space<vmem>>) attributes {dimension_semantics = [#tpu.dimension_semantics<parallel>, #tpu.dimension_semantics<parallel>], iteration_bounds = array<i64: 1, 1>, scalar_prefetch = 0 : i64, scratch_operands = 0 : i64, tpu.core_type = #tpu.core_type<tc>, window_params = [{transform_indices = @transform_0, window_bounds = array<i64: 2, 1024>}, {transform_indices = @transform_1, window_bounds = array<i64: 2, 1024>}]} {
    %c0 = arith.constant 0 : index
    %c0_0 = arith.constant 0 : index
    %0 = vector.load %arg2[%c0, %c0_0] : memref<2x1024xf32, #tpu.memory_space<vmem>>, vector<2x1024xf32>
    %c0_1 = arith.constant 0 : index
    %c0_2 = arith.constant 0 : index
    %1 = vector.load %arg3[%c0_1, %c0_2] : memref<2x1024xf32, #tpu.memory_space<vmem>>, vector<2x1024xf32>
    tpu.vector_store %arg3[%c0_1, %c0_2], %0 {strides = array<i32>} : memref<2x1024xf32, #tpu.memory_space<vmem>>, vector<2x1024xf32>,
    return
  }
  func.func @transform_0(%arg0: i32, %arg1: i32) -> (i32, i32) {
    %c0_i32 = arith.constant 0 : i32
    return %arg0, %arg1 : i32, i32
  }
  func.func @transform_1(%arg0: i32, %arg1: i32) -> (i32, i32) {
    %c0_i32 = arith.constant 0 : i32
    return %arg0, %arg1 : i32, i32
  }
}

</mosaic_0001>

<bundles_post_ra>
// kernel: tpu_custom_call.1
= control target key start
LH: loop header
LB: loop body
LE: loop exit
PB: predicated region body
PF: predicated region fallthrough
CT: control target
= control target key end

     0   :  { %6 = vsyncpa [#allocation3], 0  ;;  %s104_s0 = inlined_call_operand.hbm [shape: f32[2,1024], index: 0, kind: input, shape index: {}, may-alias: {0,1}]   ;;  %s105_s1 = inlined_call_operand.hbm [shape: f32[2,1024], index: 1, kind: output, shape index: {}, may-alias: {0,1}]  }
   0x1   :  { %7 = vsyncpa [#allocation4], 0  ;;  %s86_s6 = smov [#allocation2]  }
   0x2   :  { %s14_s7 = sshll.u32 %s86_s6, 4  ;;  %s15_s7 = int_to_ptr.vmem [resolvable:$true] %s14_s7 }
   0x3   :  { %s50_s8 = scalar_lea.vmem %s15_s7, 256  ;;  %p55_p1 = scmp.lt.s32.totalorder %s15_s7, %s15_s7 }
   0x4   :  { %p51_p0 = scmp.ne.s32.totalorder %s15_s7, %s50_s8  ;;  %p56_p2 = scmp.lt.s32.totalorder %s50_s8, %s50_s8 }
   0x6   :  { %p57_p3 = por %p56_p2, %p55_p1 }
   0x8   :  { %p58_p4 = pnand %p57_p3, %p51_p0 }
   0xa   :  { %61 = shalt.err (!%p58_p4)
}
   0xb   :  { %17 = dma.hbm_to_vmem [thread:$0]  %s104_s0, 256, %s15_s7, [#allocation3]  }
   0xc   :  { %82 = dma.done.wait [#allocation3], 256  }
   0xd   :  { %83 = vsyncadd [#allocation3], 4294967040  ;;  %s87_s11 = smov [#allocation5]   ;;  %v21_v0 = vld [vmem:[#allocation2] sm:$0xff]  ;;  %v22_v1 = vld [vmem:[#allocation2 + $0x8] sm:$0xff] }
   0xe   :  { %s31_s12 = sshll.u32 %s87_s11, 4  ;;  %23 = vst [vmem:[#allocation5] sm:$0xff] %v21_v0  ;;  %24 = vst [vmem:[#allocation5 + $0x8] sm:$0xff] %v22_v1  ;;  %s32_s12 = int_to_ptr.vmem [resolvable:$true] %s31_s12 }
   0xf   :  { %s62_s13 = scalar_lea.vmem %s32_s12, 256  ;;  %p67_p6 = scmp.lt.s32.totalorder %s32_s12, %s32_s12 }
  0x10   :  { %p63_p5 = scmp.ne.s32.totalorder %s32_s12, %s62_s13  ;;  %p68_p7 = scmp.lt.s32.totalorder %s62_s13, %s62_s13 }
  0x12   :  { %p69_p8 = por %p68_p7, %p67_p6 }
  0x14   :  { %p70_p9 = pnand %p69_p8, %p63_p5 }
  0x16   :  { %73 = shalt.err (!%p70_p9)
}
  0x17   :  { %34 = dma.vmem_to_hbm [thread:$0]  %s32_s12, 256, %s105_s1, [#allocation4]  }
  0x18   :  { %84 = dma.done.wait [#allocation4], 256  }
  0x19   :  { %85 = vsyncadd [#allocation4], 4294967040 }
  0x1a   :  { %38 = vsyncpa [#allocation3], 1 }
  0x1b   :  { %39 = vsyncpa [#allocation4], 1 }

</bundles_post_ra>
